<compile_context>
chip_gen: v6e
topology: v6e:2x2x1
jax: 0.10.0
libtpu: 0.0.40
codegen_flags: <defaults>
</compile_context>

<pallas_src>
import functools

import jax
import jax.numpy as jnp
from jax.experimental import pallas as pl
from jax.experimental.pallas import tpu as pltpu


def _round_up(x, m):
    return (x + m - 1) // m * m


def _pad_axis(arr, axis, target):
    pad = target - arr.shape[axis]
    if pad == 0:
        return arr
    widths = [(0, 0)] * arr.ndim
    widths[axis] = (0, pad)
    return jnp.pad(arr, widths)


def ffn_kernel(x_ref, w1_ref, b1_ref, w2_ref, b2_ref, o_ref, acc_ref):
    """Row tile i, hidden tile j of: relu(x @ W1 + b1) @ W2 + b2."""
    j = pl.program_id(1)

    @pl.when(j == 0)
    def _():
        acc_ref[...] = jnp.zeros_like(acc_ref)

    # (tm, C) @ (C, th) -> (tm, th); f32 accumulation on the MXU.
    h = jnp.dot(x_ref[...], w1_ref[...], preferred_element_type=jnp.float32)
    h = jnp.maximum(h + b1_ref[...], 0.0)                  # bias + ReLU in f32 (VPU)

    # (tm, th) @ (th, C) -> (tm, C); accumulate across hidden tiles in f32.
    acc_ref[...] += jnp.dot(h.astype(x_ref.dtype), w2_ref[...],
                            preferred_element_type=jnp.float32)

    @pl.when(j == pl.num_programs(1) - 1)
    def _():
        o_ref[...] = (acc_ref[...] + b2_ref[...]).astype(o_ref.dtype)


@functools.partial(jax.jit, static_argnames=("tm", "th"))
def feedforward_nn(x, w1, b1, w2, b2, *, tm=256, th=512):
    """x: (B, T, C).  w1: (C, 4C), b1: (4C,), w2: (4C, C), b2: (C,).

    Weights are stored pre-transposed as (in, out) so the kernel does x @ W + b.
    Matmuls run in x.dtype (use bf16 activations for the fast MXU path);
    accumulation and biases stay in f32.
    """
    B, T, C = x.shape
    H = w1.shape[1]
    M = B * T

    # --- Padded / tiled sizes -------------------------------------------------
    Cp = _round_up(C, 128)                      # lane-dense feature dim
    tm_eff = min(tm, _round_up(M, 8))           # row tile (multiple of 8)
    Mp = _round_up(M, tm_eff)                   # rows padded to a tile multiple
    th_eff = min(th, _round_up(H, 128))         # hidden tile (multiple of 128)
    Hp = _round_up(H, th_eff)

    dt = x.dtype
    itemsize = jnp.dtype(dt).itemsize

    # --- Pad operands (zero padding leaves the real outputs unchanged) -------
    x2 = _pad_axis(_pad_axis(x.reshape(M, C), 0, Mp), 1, Cp)
    w1p = _pad_axis(_pad_axis(w1, 0, Cp), 1, Hp).astype(dt)
    w2p = _pad_axis(_pad_axis(w2, 0, Hp), 1, Cp).astype(dt)
    b1p = _pad_axis(b1.reshape(1, H), 1, Hp).astype(jnp.float32)
    b2p = _pad_axis(b2.reshape(1, C), 1, Cp).astype(jnp.float32)

    grid = (Mp // tm_eff, Hp // th_eff)

    # --- VMEM budget (2x for double-buffered inputs/outputs + f32 scratch) ---
    vmem_est = 2 * itemsize * (tm_eff * Cp          # x tile
                               + Cp * th_eff        # W1 tile
                               + th_eff * Cp        # W2 tile
                               + tm_eff * Cp)       # out tile
    vmem_est += 2 * 4 * (th_eff + Cp)               # biases (f32)
    vmem_est += 4 * tm_eff * Cp                     # accumulator scratch (f32)
    vmem_limit = min(max(int(vmem_est * 3 // 2), 32 * 1024 * 1024),
                     48 * 1024 * 1024)

    cost = pl.CostEstimate(
        flops=4 * Mp * Cp * Hp,                     # two matmuls
        transcendentals=0,
        bytes_accessed=itemsize * (2 * Mp * Cp + 2 * Cp * Hp) + 4 * (Hp + Cp),
    )

    out2d = pl.pallas_call(
        ffn_kernel,
        out_shape=jax.ShapeDtypeStruct((Mp, Cp), dt),
        grid_spec=pltpu.PrefetchScalarGridSpec(
            num_scalar_prefetch=0,
            grid=grid,
            in_specs=[
                pl.BlockSpec((tm_eff, Cp), lambda i, j: (i, 0)),   # x row tile
                pl.BlockSpec((Cp, th_eff), lambda i, j: (0, j)),   # W1 column tile
                pl.BlockSpec((1, th_eff), lambda i, j: (0, j)),    # b1 tile
                pl.BlockSpec((th_eff, Cp), lambda i, j: (j, 0)),   # W2 row tile
                pl.BlockSpec((1, Cp), lambda i, j: (0, 0)),        # b2
            ],
            out_specs=pl.BlockSpec((tm_eff, Cp), lambda i, j: (i, 0)),
            scratch_shapes=[pltpu.VMEM((tm_eff, Cp), jnp.float32)],
        ),
        compiler_params=pltpu.CompilerParams(
            dimension_semantics=("parallel", "arbitrary"),
            vmem_limit_bytes=vmem_limit,
        ),
        cost_estimate=cost,
    )(x2, w1p, b1p, w2p, b2p)

    return out2d[:M, :C].reshape(B, T, C)


def init_params(key, n_embd):
    """Deterministic init mimicking nn.Linear defaults (uniform(-1/sqrt(in), 1/sqrt(in)))."""
    k1, k2, k3, k4 = jax.random.split(key, 4)
    hidden = 4 * n_embd
    bound1 = 1.0 / jnp.sqrt(n_embd)
    bound2 = 1.0 / jnp.sqrt(hidden)
    # Stored as (in, out) — i.e. PyTorch weight.T — so kernel does x @ W.
    w1 = jax.random.uniform(k1, (n_embd, hidden), jnp.float32, -bound1, bound1)
    b1 = jax.random.uniform(k2, (hidden,), jnp.float32, -bound1, bound1)
    w2 = jax.random.uniform(k3, (hidden, n_embd), jnp.float32, -bound2, bound2)
    b2 = jax.random.uniform(k4, (n_embd,), jnp.float32, -bound2, bound2)
    return w1, b1, w2, b2


if __name__ == "__main__":
    n_embd = 32
    B, T = 2, 8

    key = jax.random.PRNGKey(0)
    kx, kp = jax.random.split(key)
    x = jax.random.normal(kx, (B, T, n_embd), jnp.float32)
    w1, b1, w2, b2 = init_params(kp, n_embd)

    # f32 path: tight check against a pure-JAX reference (eval-mode dropout == identity).
    out = feedforward_nn(x, w1, b1, w2, b2)
    out = jax.block_until_ready(out)
    ref = jnp.maximum(x.reshape(-1, n_embd) @ w1 + b1, 0.0) @ w2 + b2
    ref = ref.reshape(B, T, n_embd)
    assert out.shape == (B, T, n_embd)
    assert jnp.allclose(out, ref, atol=1e-4, rtol=1e-4)

    # bf16 fast path (bf16 MXU inputs, f32 accumulation): loose tolerance check.
    out_bf16 = feedforward_nn(x.astype(jnp.bfloat16), w1, b1, w2, b2)
    out_bf16 = jax.block_until_ready(out_bf16)
    assert out_bf16.dtype == jnp.bfloat16
    assert jnp.allclose(out_bf16.astype(jnp.float32), ref, atol=0.1, rtol=0.1)

    print("KERNEL_OK")
</pallas_src>

<mosaic_0001>
module attributes {stable_mosaic.version = 11 : i64} {
  func.func @ffn_kernel(%arg0: i32, %arg1: i32, %arg2: memref<16x128xf32, #tpu.memory_space<vmem>>, %arg3: memref<128x128xf32, #tpu.memory_space<vmem>>, %arg4: memref<1x128xf32, #tpu.memory_space<vmem>>, %arg5: memref<128x128xf32, #tpu.memory_space<vmem>>, %arg6: memref<1x128xf32, #tpu.memory_space<vmem>>, %arg7: memref<16x128xf32, #tpu.memory_space<vmem>>, %arg8: memref<16x128xf32, #tpu.memory_space<vmem>>) attributes {dimension_semantics = [#tpu.dimension_semantics<parallel>, #tpu.dimension_semantics<arbitrary>], iteration_bounds = array<i64: 1, 1>, scalar_prefetch = 0 : i64, scratch_operands = 1 : i64, tpu.core_type = #tpu.core_type<tc>, window_params = [{transform_indices = @transform_0, window_bounds = array<i64: 16, 128>}, {transform_indices = @transform_1, window_bounds = array<i64: 128, 128>}, {transform_indices = @transform_2, window_bounds = array<i64: 1, 128>}, {transform_indices = @transform_3, window_bounds = array<i64: 128, 128>}, {pipeline_mode = #tpu.pipeline_mode<synchronous>, transform_indices = @transform_4, window_bounds = array<i64: 1, 128>}, {transform_indices = @transform_5, window_bounds = array<i64: 16, 128>}]} {
    %c0_i32 = arith.constant 0 : i32
    %0 = arith.cmpi eq, %arg1, %c0_i32 : i32
    %1 = arith.extui %0 : i1 to i32
    %c0_i32_0 = arith.constant 0 : i32
    %2 = arith.cmpi ne, %1, %c0_i32_0 : i32
    scf.if %2 {
      %cst_16 = arith.constant 0.000000e+00 : f32
      %19 = vector.broadcast %cst_16 : f32 to vector<16x128xf32>
      %c0_17 = arith.constant 0 : index
      %c0_18 = arith.constant 0 : index
      %20 = vector.load %arg8[%c0_17, %c0_18] : memref<16x128xf32, #tpu.memory_space<vmem>>, vector<16x128xf32>
      tpu.vector_store %arg8[%c0_17, %c0_18], %19 {strides = array<i32>} : memref<16x128xf32, #tpu.memory_space<vmem>>, vector<16x128xf32>,
    } else {
    }
    %c0 = arith.constant 0 : index
    %c0_1 = arith.constant 0 : index
    %3 = vector.load %arg2[%c0, %c0_1] : memref<16x128xf32, #tpu.memory_space<vmem>>, vector<16x128xf32>
    %c0_2 = arith.constant 0 : index
    %c0_3 = arith.constant 0 : index
    %4 = vector.load %arg3[%c0_2, %c0_3] : memref<128x128xf32, #tpu.memory_space<vmem>>, vector<128x128xf32>
    %cst = arith.constant dense<0.000000e+00> : vector<16x128xf32>
    %5 = tpu.matmul %3, %4, %cst {dimension_numbers = #tpu.dot_dimension_numbers<[1], [0], [0], [1], [0, 0, 1, 1], [], []>} : vector<16x128xf32>, vector<128x128xf32>, vector<16x128xf32> -> vector<16x128xf32>
    %c0_4 = arith.constant 0 : index
    %c0_5 = arith.constant 0 : index
    %6 = vector.load %arg4[%c0_4, %c0_5] : memref<1x128xf32, #tpu.memory_space<vmem>>, vector<1x128xf32>
    %7 = vector.broadcast %6 : vector<1x128xf32> to vector<16x128xf32>
    %8 = arith.addf %5, %7 : vector<16x128xf32>
    %cst_6 = arith.constant 0.000000e+00 : f32
    %9 = vector.broadcast %cst_6 : f32 to vector<16x128xf32>
    %10 = arith.maximumf %8, %9 : vector<16x128xf32>
    %c0_7 = arith.constant 0 : index
    %c0_8 = arith.constant 0 : index
    %11 = vector.load %arg8[%c0_7, %c0_8] : memref<16x128xf32, #tpu.memory_space<vmem>>, vector<16x128xf32>
    %c0_9 = arith.constant 0 : index
    %c0_10 = arith.constant 0 : index
    %12 = vector.load %arg5[%c0_9, %c0_10] : memref<128x128xf32, #tpu.memory_space<vmem>>, vector<128x128xf32>
    %cst_11 = arith.constant dense<0.000000e+00> : vector<16x128xf32>
    %13 = tpu.matmul %10, %12, %cst_11 {dimension_numbers = #tpu.dot_dimension_numbers<[1], [0], [0], [1], [0, 0, 1, 1], [], []>} : vector<16x128xf32>, vector<128x128xf32>, vector<16x128xf32> -> vector<16x128xf32>
    %14 = arith.addf %11, %13 : vector<16x128xf32>
    %c0_12 = arith.constant 0 : index
    %c0_13 = arith.constant 0 : index
    %15 = vector.load %arg8[%c0_12, %c0_13] : memref<16x128xf32, #tpu.memory_space<vmem>>, vector<16x128xf32>
    tpu.vector_store %arg8[%c0_12, %c0_13], %14 {strides = array<i32>} : memref<16x128xf32, #tpu.memory_space<vmem>>, vector<16x128xf32>,
    %c0_i32_14 = arith.constant 0 : i32
    %16 = arith.cmpi eq, %arg1, %c0_i32_14 : i32
    %17 = arith.extui %16 : i1 to i32
    %c0_i32_15 = arith.constant 0 : i32
    %18 = arith.cmpi ne, %17, %c0_i32_15 : i32
    scf.if %18 {
      %c0_16 = arith.constant 0 : index
      %c0_17 = arith.constant 0 : index
      %19 = vector.load %arg8[%c0_16, %c0_17] : memref<16x128xf32, #tpu.memory_space<vmem>>, vector<16x128xf32>
      %c0_18 = arith.constant 0 : index
      %c0_19 = arith.constant 0 : index
      %20 = vector.load %arg6[%c0_18, %c0_19] : memref<1x128xf32, #tpu.memory_space<vmem>>, vector<1x128xf32>
      %21 = vector.broadcast %20 : vector<1x128xf32> to vector<16x128xf32>
      %22 = arith.addf %19, %21 : vector<16x128xf32>
      %c0_20 = arith.constant 0 : index
      %c0_21 = arith.constant 0 : index
      %23 = vector.load %arg7[%c0_20, %c0_21] : memref<16x128xf32, #tpu.memory_space<vmem>>, vector<16x128xf32>
      tpu.vector_store %arg7[%c0_20, %c0_21], %22 {strides = array<i32>} : memref<16x128xf32, #tpu.memory_space<vmem>>, vector<16x128xf32>,
    } else {
    }
    return
  }
  func.func @transform_0(%arg0: i32, %arg1: i32) -> (i32, i32) {
    %c0_i32 = arith.constant 0 : i32
    %c0_i32_0 = arith.constant 0 : i32
    return %arg0, %c0_i32 : i32, i32
  }
  func.func @transform_1(%arg0: i32, %arg1: i32) -> (i32, i32) {
    %c0_i32 = arith.constant 0 : i32
    %c0_i32_0 = arith.constant 0 : i32
    return %c0_i32, %arg1 : i32, i32
  }
  func.func @transform_2(%arg0: i32, %arg1: i32) -> (i32, i32) {
    %c0_i32 = arith.constant 0 : i32
    %c0_i32_0 = arith.constant 0 : i32
    return %c0_i32, %arg1 : i32, i32
  }
  func.func @transform_3(%arg0: i32, %arg1: i32) -> (i32, i32) {
    %c0_i32 = arith.constant 0 : i32
    %c0_i32_0 = arith.constant 0 : i32
    return %arg1, %c0_i32 : i32, i32
  }
  func.func @transform_4(%arg0: i32, %arg1: i32) -> (i32, i32) {
    %c0_i32 = arith.constant 0 : i32
    %c0_i32_0 = arith.constant 0 : i32
    %c0_i32_1 = arith.constant 0 : i32
    return %c0_i32, %c0_i32_0 : i32, i32
  }
  func.func @transform_5(%arg0: i32, %arg1: i32) -> (i32, i32) {
    %c0_i32 = arith.constant 0 : i32
    %c0_i32_0 = arith.constant 0 : i32
    return %arg0, %c0_i32 : i32, i32
  }
}

</mosaic_0001>

<bundles_post_ra>
// kernel: feedforward_nn.1
= control target key start
LH: loop header
LB: loop body
LE: loop exit
PB: predicated region body
PF: predicated region fallthrough
CT: control target
= control target key end

     0   :  { %s497_s1 = inlined_call_operand.vmem [shape: f32[128,128], index: 1, kind: input, shape index: {}]   ;;  %s498_s0 = inlined_call_operand.vmem [shape: f32[16,128], index: 0, kind: input, shape index: {}]   ;;  %s499_s3 = inlined_call_operand.vmem [shape: f32[128,128], index: 3, kind: input, shape index: {}]   ;;  %s500_s2 = inlined_call_operand.vmem [shape: f32[1,128], index: 2, kind: input, shape index: {}]   ;;  %s501_s4 = inlined_call_operand.vmem [shape: f32[1,128], index: 4, kind: input, shape index: {}]   ;;  %s502_s5 = inlined_call_operand.vmem [shape: f32[16,128], index: 5, kind: output, shape index: {}]  }
   0x1   :  { %v43_v0 = vld [vmem:[%s497_s1 + $0x78] sm:$0xff]  ;;  %v42_v1 = vld [vmem:[%s497_s1 + $0x70] sm:$0xff]  ;;  %v41_v2 = vld [vmem:[%s497_s1 + $0x68] sm:$0xff] }
   0x2   :  { %283 = vmatprep.subr.mxu0 %v43_v0  ;;  %v40_v3 = vld [vmem:[%s497_s1 + $0x60] sm:$0xff]  ;;  %v39_v5 = vld [vmem:[%s497_s1 + $0x58] sm:$0xff]  ;;  %v144_v7 = vld [vmem:[%s499_s3 + $0x70] sm:$0xff] }
   0x3   :  { %284 = vmatpush3.msra.mxu0 %v43_v0  ;;  %v26_v4 = vld [vmem:[%s498_s0] sm:$0xff]  ;;  %v145_v6 = vld [vmem:[%s499_s3 + $0x78] sm:$0xff]  ;;  %v38_v8 = vld [vmem:[%s497_s1 + $0x50] sm:$0xff] }
   0x4   :  { %285 = vmatprep.subr.mxu0 %v42_v1  ;;  %315 = vmatprep.mubr.f32.mxu0 %v26_v4  ;;  %v143_v9 = vld [vmem:[%s499_s3 + $0x68] sm:$0xff]  ;;  %v142_v11 = vld [vmem:[%s499_s3 + $0x60] sm:$0xff]  ;;  %v141_v13 = vld [vmem:[%s499_s3 + $0x58] sm:$0xff] }
   0x5   :  { %286 = vmatpush3.msra.mxu0 %v42_v1  ;;  %318 = vmatprep.subr.mxu1 %v145_v6  ;;  %v37_v10 = vld [vmem:[%s497_s1 + $0x48] sm:$0xff]  ;;  %v36_v12 = vld [vmem:[%s497_s1 + $0x40] sm:$0xff]  ;;  %v35_v14 = vld [vmem:[%s497_s1 + $0x38] sm:$0xff] }
   0x6   :  { %287 = vmatprep.subr.mxu0 %v41_v2  ;;  %319 = vmatpush3.msra.mxu1 %v145_v6  ;;  %v140_v15 = vld [vmem:[%s499_s3 + $0x50] sm:$0xff]  ;;  %v139_v17 = vld [vmem:[%s499_s3 + $0x48] sm:$0xff]  ;;  %v138_v19 = vld [vmem:[%s499_s3 + $0x40] sm:$0xff] }
   0x7   :  { %288 = vmatpush3.msra.mxu0 %v41_v2  ;;  %320 = vmatprep.subr.mxu1 %v144_v7  ;;  %v34_v16 = vld [vmem:[%s497_s1 + $0x30] sm:$0xff]  ;;  %v33_v18 = vld [vmem:[%s497_s1 + $0x28] sm:$0xff]  ;;  %v32_v20 = vld [vmem:[%s497_s1 + $0x20] sm:$0xff] }
   0x8   :  { %289 = vmatprep.subr.mxu0 %v40_v3  ;;  %321 = vmatpush3.msra.mxu1 %v144_v7  ;;  %v137_v21 = vld [vmem:[%s499_s3 + $0x38] sm:$0xff]  ;;  %v136_v23 = vld [vmem:[%s499_s3 + $0x30] sm:$0xff]  ;;  %v135_v25 = vld [vmem:[%s499_s3 + $0x28] sm:$0xff] }
   0x9   :  { %290 = vmatpush3.msra.mxu0 %v40_v3  ;;  %322 = vmatprep.subr.mxu1 %v143_v9  ;;  %v31_v22 = vld [vmem:[%s497_s1 + $0x18] sm:$0xff]  ;;  %v30_v24 = vld [vmem:[%s497_s1 + $0x10] sm:$0xff]  ;;  %v29_v26 = vld [vmem:[%s497_s1 + $0x8] sm:$0xff] }
   0xa   :  { %291 = vmatprep.subr.mxu0 %v39_v5  ;;  %323 = vmatpush3.msra.mxu1 %v143_v9  ;;  %v134_v27 = vld [vmem:[%s499_s3 + $0x20] sm:$0xff]  ;;  %v27_v29 = vld [vmem:[%s498_s0 + $0x8] sm:$0xff]  ;;  %v133_v30 = vld [vmem:[%s499_s3 + $0x18] sm:$0xff] }
   0xb   :  { %292 = vmatpush3.msra.mxu0 %v39_v5  ;;  %324 = vmatprep.subr.mxu1 %v142_v11  ;;  %v28_v28 = vld [vmem:[%s497_s1] sm:$0xff]  ;;  %v132_v31 = vld [vmem:[%s499_s3 + $0x10] sm:$0xff]  ;;  %v131_v32 = vld [vmem:[%s499_s3 + $0x8] sm:$0xff] }
   0xc   :  { %293 = vmatprep.subr.mxu0 %v38_v8  ;;  %325 = vmatpush3.msra.mxu1 %v142_v11  ;;  %v130_v33 = vld [vmem:[%s499_s3] sm:$0xff] }
   0xd   :  { %294 = vmatpush3.msra.mxu0 %v38_v8  ;;  %326 = vmatprep.subr.mxu1 %v141_v13  ;;  %v245_v34 = vld [vmem:[%s500_s2] ss:$0 sm:$0xff] }
   0xe   :  { %295 = vmatprep.subr.mxu0 %v37_v10  ;;  %327 = vmatpush3.msra.mxu1 %v141_v13  ;;  %v246_v41 = vld [vmem:[%s501_s4] ss:$0 sm:$0xff] }
   0xf   :  { %296 = vmatpush3.msra.mxu0 %v37_v10  ;;  %328 = vmatprep.subr.mxu1 %v140_v15 }
  0x10   :  { %297 = vmatprep.subr.mxu0 %v36_v12  ;;  %329 = vmatpush3.msra.mxu1 %v140_v15 }
  0x11   :  { %298 = vmatpush3.msra.mxu0 %v36_v12  ;;  %330 = vmatprep.subr.mxu1 %v139_v17 }
  0x12   :  { %299 = vmatprep.subr.mxu0 %v35_v14  ;;  %331 = vmatpush3.msra.mxu1 %v139_v17 }
  0x13   :  { %300 = vmatpush3.msra.mxu0 %v35_v14  ;;  %332 = vmatprep.subr.mxu1 %v138_v19 }
  0x14   :  { %301 = vmatprep.subr.mxu0 %v34_v16  ;;  %333 = vmatpush3.msra.mxu1 %v138_v19 }
  0x15   :  { %302 = vmatpush3.msra.mxu0 %v34_v16  ;;  %334 = vmatprep.subr.mxu1 %v137_v21 }
  0x16   :  { %303 = vmatprep.subr.mxu0 %v33_v18  ;;  %335 = vmatpush3.msra.mxu1 %v137_v21 }
  0x17   :  { %304 = vmatpush3.msra.mxu0 %v33_v18  ;;  %336 = vmatprep.subr.mxu1 %v136_v23 }
  0x18   :  { %305 = vmatprep.subr.mxu0 %v32_v20  ;;  %337 = vmatpush3.msra.mxu1 %v136_v23 }
  0x19   :  { %306 = vmatpush3.msra.mxu0 %v32_v20  ;;  %338 = vmatprep.subr.mxu1 %v135_v25 }
  0x1a   :  { %307 = vmatprep.subr.mxu0 %v31_v22  ;;  %339 = vmatpush3.msra.mxu1 %v135_v25 }
  0x1b   :  { %308 = vmatpush3.msra.mxu0 %v31_v22  ;;  %340 = vmatprep.subr.mxu1 %v134_v27 }
  0x1c   :  { %309 = vmatprep.subr.mxu0 %v30_v24  ;;  %341 = vmatpush3.msra.mxu1 %v134_v27 }
  0x1d   :  { %310 = vmatpush3.msra.mxu0 %v30_v24  ;;  %342 = vmatprep.subr.mxu1 %v133_v30 }
  0x1e   :  { %311 = vmatprep.subr.mxu0 %v29_v26  ;;  %343 = vmatpush3.msra.mxu1 %v133_v30 }
  0x1f   :  { %312 = vmatpush3.msra.mxu0 %v29_v26  ;;  %344 = vmatprep.subr.mxu1 %v132_v31 }
  0x20   :  { %313 = vmatprep.subr.mxu0 %v28_v28  ;;  %345 = vmatpush3.msra.mxu1 %v132_v31 }
  0x21   :  { %314 = vmatpush3.msra.mxu0 %v28_v28  ;;  %346 = vmatprep.subr.mxu1 %v131_v32 }
  0x22   :  { %316 = vmatmul.mubr.f32.vlgmr.msra.gmra.mxu0 %v27_v29  ;;  %347 = vmatpush3.msra.mxu1 %v131_v32 }
  0x23   :  { %348 = vmatprep.subr.mxu1 %v130_v33 }
  0x24   :  { %349 = vmatpush3.msra.mxu1 %v130_v33 }
  0xe2   :  { %v317_v35 = vpop.f32.mrf.mxu0 }
  0xe3   :  { %v123_v36 = vadd.f32 %v317_v35, %v245_v34 }
  0xe4   :  { %v117_v37 = vpop.f32.mrf.mxu0 }
  0xe5   :  { %v118_v38 = vadd.f32 %v245_v34, %v117_v37  ;;  %v127_v40 = vmax.f32 %v123_v36, 0.0 }
  0xe7   :  { %v126_v39 = vmax.f32 %v118_v38, 0.0 }
  0xe9   :  { %350 = vmatprep.mubr.f32.mxu1 %v126_v39 }
  0xea   :  { %351 = vmatmul.mubr.f32.vlgmr.msra.gmra.mxu1 %v127_v40 }
 0x1aa   :  { %v352_v42 = vpop.f32.mrf.mxu1 }
 0x1ab   :  { %v238_v43 = vadd.f32 %v352_v42, %v246_v41 }
 0x1ac   :  { %v212_v44 = vpop.f32.mrf.mxu1 }
 0x1ad   :  { %240 = vst [vmem:[%s502_s5 + $0x8] sm:$0xff] %v238_v43  ;;  %v237_v45 = vadd.f32 %v246_v41, %v212_v44 }
 0x1af   :  { %239 = vst [vmem:[%s502_s5] sm:$0xff] %v237_v45 }

</bundles_post_ra>
